<compile_context>
chip_gen: v5e
topology: v5e:2x2
jax: 0.10.0
libtpu: 0.0.40
codegen_flags: <defaults>
</compile_context>

<pallas_src>
import functools

import jax
import jax.numpy as jnp
from jax import lax
from jax.experimental import pallas as pl
from jax.experimental.pallas import tpu as pltpu


def code_add_kernel(x1_ref, x2_ref, wq_t_ref, bq_ref, wt_t_ref, bt_ref,
                    wo_t_ref, bo_ref, o_ref, *, b_blk, l1, l2):
    # x1_ref: (b_blk*l1, 2*dm)   x2_ref: (b_blk*l2, dm)   o_ref: (b_blk*l2, dm_out)
    d_head = wq_t_ref.shape[1]

    # q / t projections as single large 2-D matmuls over the whole batch block.
    q = jnp.dot(x1_ref[...], wq_t_ref[...],
                preferred_element_type=jnp.float32) + bq_ref[...]     # (b_blk*l1, dh)
    t = jnp.dot(x2_ref[...], wt_t_ref[...],
                preferred_element_type=jnp.float32) + bt_ref[...]     # (b_blk*l2, dh)

    # Split the leading dim back out (minor dim unchanged -> layout-trivial reshape).
    q3 = q.reshape(b_blk, l1, d_head)
    t3 = t.reshape(b_blk, l2, d_head)

    # scores = t @ q^T per batch, expressed as a batched contraction over d_head
    # (no explicit transpose of q).
    s = lax.dot_general(t3, q3,
                        dimension_numbers=(((2,), (2,)), ((0,), (0,))),
                        preferred_element_type=jnp.float32)           # (b_blk, l2, l1)

    # Softmax over the last dim (L1).
    m = jnp.max(s, axis=-1, keepdims=True)
    p = jnp.exp(s - m)
    attn = p * pl.reciprocal(jnp.sum(p, axis=-1, keepdims=True), approx=True)

    # Output projection: one fused 2-D matmul over the whole block.
    out = jnp.dot(attn.reshape(b_blk * l2, l1), wo_t_ref[...],
                  preferred_element_type=jnp.float32) + bo_ref[...]   # (b_blk*l2, dm_out)
    o_ref[...] = out.astype(o_ref.dtype)


def code_add(x1, x2, params, *, b_blk=128):
    wq, bq, wt, bt, wo, bo = (params[k] for k in ("wq", "bq", "wt", "bt", "wo", "bo"))
    B, L1, two_dm = x1.shape
    B2, L2, dm = x2.shape
    assert B == B2
    d_head = wq.shape[0]
    d_model = wo.shape[0]
    assert L1 == wo.shape[1], "softmax length must equal w_o input features (32)"

    # One-time wrapper-side weight transposes (in_f, out_f) so the kernel does plain matmuls.
    wq_t = wq.T                      # (2*dm, d_head)
    wt_t = wt.T                      # (dm,   d_head)
    wo_t = wo.T                      # (L1,   d_model)

    # Batch blocking: many batches per grid step, multiple of 8 sublanes; pad B if needed.
    B_blk = min(b_blk, B)
    B_blk = max(8, pl.cdiv(B_blk, 8) * 8)
    n_blk = pl.cdiv(B, B_blk)
    B_pad = n_blk * B_blk
    if B_pad != B:
        pad = B_pad - B
        x1 = jnp.pad(x1, ((0, pad), (0, 0), (0, 0)))
        x2 = jnp.pad(x2, ((0, pad), (0, 0), (0, 0)))

    # Pre-flatten to 2-D in the wrapper (free XLA reshapes) so in-kernel matmuls are 2-D.
    x1f = x1.reshape(B_pad * L1, two_dm)
    x2f = x2.reshape(B_pad * L2, dm)

    kernel = functools.partial(code_add_kernel, b_blk=B_blk, l1=L1, l2=L2)

    out_flat = pl.pallas_call(
        kernel,
        out_shape=jax.ShapeDtypeStruct((B_pad * L2, d_model), x1.dtype),
        grid_spec=pltpu.PrefetchScalarGridSpec(
            num_scalar_prefetch=0,
            grid=(n_blk,),
            in_specs=[
                pl.BlockSpec((B_blk * L1, two_dm), lambda b: (b, 0)),
                pl.BlockSpec((B_blk * L2, dm), lambda b: (b, 0)),
                pl.BlockSpec(wq_t.shape, lambda b: (0, 0)),
                pl.BlockSpec(bq.shape, lambda b: (0, 0)),
                pl.BlockSpec(wt_t.shape, lambda b: (0, 0)),
                pl.BlockSpec(bt.shape, lambda b: (0, 0)),
                pl.BlockSpec(wo_t.shape, lambda b: (0, 0)),
                pl.BlockSpec(bo.shape, lambda b: (0, 0)),
            ],
            out_specs=pl.BlockSpec((B_blk * L2, d_model), lambda b: (b, 0)),
        ),
        compiler_params=pltpu.CompilerParams(
            dimension_semantics=("parallel",)),
    )(x1f, x2f, wq_t, bq, wt_t, bt, wo_t, bo)

    return out_flat.reshape(B_pad, L2, d_model)[:B]


def init_params(key, d_model, d_head):
    # Deterministic synthetic init (PyTorch-Linear-style uniform bounds).
    ks = jax.random.split(key, 6)

    def lin(kw, kb, out_f, in_f):
        bound = 1.0 / jnp.sqrt(in_f)
        w = jax.random.uniform(kw, (out_f, in_f), jnp.float32, -bound, bound)
        b = jax.random.uniform(kb, (1, out_f), jnp.float32, -bound, bound)
        return w, b

    wq, bq = lin(ks[0], ks[1], d_head, d_model * 2)   # q: Linear(2*d_model -> d_head)
    wt, bt = lin(ks[2], ks[3], d_head, d_model)       # t: Linear(d_model -> d_head)
    wo, bo = lin(ks[4], ks[5], d_model, 32)           # w_o: Linear(32 -> d_model)
    return dict(wq=wq, bq=bq, wt=wt, bt=bt, wo=wo, bo=bo)


def reference(x1, x2, p):
    q = x1 @ p["wq"].T + p["bq"]
    t = x2 @ p["wt"].T + p["bt"]
    s = jnp.einsum("bld,bmd->blm", t, q)
    a = jax.nn.softmax(s, axis=-1)
    return a @ p["wo"].T + p["bo"]


if __name__ == "__main__":
    d_model, d_head = 16, 8
    B, L1, L2 = 10, 32, 8      # L1 = 32 because w_o expects 32 input features

    key = jax.random.PRNGKey(0)
    k1, k2, kp = jax.random.split(key, 3)
    x1 = jax.random.normal(k1, (B, L1, d_model * 2), jnp.float32)
    x2 = jax.random.normal(k2, (B, L2, d_model), jnp.float32)
    params = init_params(kp, d_model, d_head)

    # b_blk=8 -> 2 grid steps; also exercises batch padding (B=10 -> 16).
    out = code_add(x1, x2, params, b_blk=8)
    jax.block_until_ready(out)

    ref = reference(x1, x2, params)
    assert out.shape == (B, L2, d_model)
    # approx=True reciprocal in the softmax denominator -> slightly loosened tolerance.
    assert jnp.allclose(out, ref, atol=5e-3, rtol=1e-3)
    print("KERNEL_OK")
</pallas_src>

<mosaic_0001>
module attributes {stable_mosaic.version = 11 : i64} {
  func.func @code_add_kernel(%arg0: i32, %arg1: memref<256x32xf32, #tpu.memory_space<vmem>>, %arg2: memref<64x16xf32, #tpu.memory_space<vmem>>, %arg3: memref<32x8xf32, #tpu.memory_space<vmem>>, %arg4: memref<1x8xf32, #tpu.memory_space<vmem>>, %arg5: memref<16x8xf32, #tpu.memory_space<vmem>>, %arg6: memref<1x8xf32, #tpu.memory_space<vmem>>, %arg7: memref<32x16xf32, #tpu.memory_space<vmem>>, %arg8: memref<1x16xf32, #tpu.memory_space<vmem>>, %arg9: memref<64x16xf32, #tpu.memory_space<vmem>>) attributes {dimension_semantics = [#tpu.dimension_semantics<parallel>], iteration_bounds = array<i64: 2>, scalar_prefetch = 0 : i64, scratch_operands = 0 : i64, tpu.core_type = #tpu.core_type<tc>, window_params = [{transform_indices = @transform_0, window_bounds = array<i64: 256, 32>}, {transform_indices = @transform_1, window_bounds = array<i64: 64, 16>}, {pipeline_mode = #tpu.pipeline_mode<synchronous>, transform_indices = @transform_2, window_bounds = array<i64: 32, 8>}, {pipeline_mode = #tpu.pipeline_mode<synchronous>, transform_indices = @transform_3, window_bounds = array<i64: 1, 8>}, {pipeline_mode = #tpu.pipeline_mode<synchronous>, transform_indices = @transform_4, window_bounds = array<i64: 16, 8>}, {pipeline_mode = #tpu.pipeline_mode<synchronous>, transform_indices = @transform_5, window_bounds = array<i64: 1, 8>}, {pipeline_mode = #tpu.pipeline_mode<synchronous>, transform_indices = @transform_6, window_bounds = array<i64: 32, 16>}, {pipeline_mode = #tpu.pipeline_mode<synchronous>, transform_indices = @transform_7, window_bounds = array<i64: 1, 16>}, {transform_indices = @transform_8, window_bounds = array<i64: 64, 16>}]} {
    %c0 = arith.constant 0 : index
    %c0_0 = arith.constant 0 : index
    %0 = vector.load %arg1[%c0, %c0_0] : memref<256x32xf32, #tpu.memory_space<vmem>>, vector<256x32xf32>
    %c0_1 = arith.constant 0 : index
    %c0_2 = arith.constant 0 : index
    %1 = vector.load %arg3[%c0_1, %c0_2] : memref<32x8xf32, #tpu.memory_space<vmem>>, vector<32x8xf32>
    %cst = arith.constant dense<0.000000e+00> : vector<256x8xf32>
    %2 = tpu.matmul %0, %1, %cst {dimension_numbers = #tpu.dot_dimension_numbers<[1], [0], [0], [1], [0, 0, 1, 1], [], []>} : vector<256x32xf32>, vector<32x8xf32>, vector<256x8xf32> -> vector<256x8xf32>
    %c0_3 = arith.constant 0 : index
    %c0_4 = arith.constant 0 : index
    %3 = vector.load %arg4[%c0_3, %c0_4] : memref<1x8xf32, #tpu.memory_space<vmem>>, vector<1x8xf32>
    %4 = vector.broadcast %3 : vector<1x8xf32> to vector<256x8xf32>
    %5 = arith.addf %2, %4 : vector<256x8xf32>
    %c0_5 = arith.constant 0 : index
    %c0_6 = arith.constant 0 : index
    %6 = vector.load %arg2[%c0_5, %c0_6] : memref<64x16xf32, #tpu.memory_space<vmem>>, vector<64x16xf32>
    %c0_7 = arith.constant 0 : index
    %c0_8 = arith.constant 0 : index
    %7 = vector.load %arg5[%c0_7, %c0_8] : memref<16x8xf32, #tpu.memory_space<vmem>>, vector<16x8xf32>
    %cst_9 = arith.constant dense<0.000000e+00> : vector<64x8xf32>
    %8 = tpu.matmul %6, %7, %cst_9 {dimension_numbers = #tpu.dot_dimension_numbers<[1], [0], [0], [1], [0, 0, 1, 1], [], []>} : vector<64x16xf32>, vector<16x8xf32>, vector<64x8xf32> -> vector<64x8xf32>
    %c0_10 = arith.constant 0 : index
    %c0_11 = arith.constant 0 : index
    %9 = vector.load %arg6[%c0_10, %c0_11] : memref<1x8xf32, #tpu.memory_space<vmem>>, vector<1x8xf32>
    %10 = vector.broadcast %9 : vector<1x8xf32> to vector<64x8xf32>
    %11 = arith.addf %8, %10 : vector<64x8xf32>
    %12 = vector.shape_cast %5 : vector<256x8xf32> to vector<8x32x8xf32>
    %13 = vector.shape_cast %11 : vector<64x8xf32> to vector<8x8x8xf32>
    %cst_12 = arith.constant dense<0.000000e+00> : vector<8x8x32xf32>
    %14 = tpu.matmul %13, %12, %cst_12 {dimension_numbers = #tpu.dot_dimension_numbers<[2], [2], [1], [1], [0, 0, 0, 1, 1, 1], [0], [0]>} : vector<8x8x8xf32>, vector<8x32x8xf32>, vector<8x8x32xf32> -> vector<8x8x32xf32>
    %cst_13 = arith.constant dense<0xFF800000> : vector<8x8xf32>
    %15 = vector.multi_reduction <maximumf>, %14, %cst_13 [2] : vector<8x8x32xf32> to vector<8x8xf32>
    %16 = vector.shape_cast %15 : vector<8x8xf32> to vector<8x8x1xf32>
    %17 = vector.broadcast %16 : vector<8x8x1xf32> to vector<8x8x32xf32>
    %18 = arith.subf %14, %17 : vector<8x8x32xf32>
    %19 = math.exp %18 : vector<8x8x32xf32>
    %cst_14 = arith.constant dense<0.000000e+00> : vector<8x8xf32>
    %20 = vector.multi_reduction <add>, %19, %cst_14 [2] : vector<8x8x32xf32> to vector<8x8xf32>
    %21 = vector.shape_cast %20 : vector<8x8xf32> to vector<8x8x1xf32>
    %22 = tpu.reciprocal %21 {approx = true} : vector<8x8x1xf32> -> vector<8x8x1xf32>
    %23 = vector.broadcast %22 : vector<8x8x1xf32> to vector<8x8x32xf32>
    %24 = arith.mulf %19, %23 : vector<8x8x32xf32>
    %25 = vector.shape_cast %24 : vector<8x8x32xf32> to vector<64x32xf32>
    %c0_15 = arith.constant 0 : index
    %c0_16 = arith.constant 0 : index
    %26 = vector.load %arg7[%c0_15, %c0_16] : memref<32x16xf32, #tpu.memory_space<vmem>>, vector<32x16xf32>
    %cst_17 = arith.constant dense<0.000000e+00> : vector<64x16xf32>
    %27 = tpu.matmul %25, %26, %cst_17 {dimension_numbers = #tpu.dot_dimension_numbers<[1], [0], [0], [1], [0, 0, 1, 1], [], []>} : vector<64x32xf32>, vector<32x16xf32>, vector<64x16xf32> -> vector<64x16xf32>
    %c0_18 = arith.constant 0 : index
    %c0_19 = arith.constant 0 : index
    %28 = vector.load %arg8[%c0_18, %c0_19] : memref<1x16xf32, #tpu.memory_space<vmem>>, vector<1x16xf32>
    %29 = vector.broadcast %28 : vector<1x16xf32> to vector<64x16xf32>
    %30 = arith.addf %27, %29 : vector<64x16xf32>
    %c0_20 = arith.constant 0 : index
    %c0_21 = arith.constant 0 : index
    %31 = vector.load %arg9[%c0_20, %c0_21] : memref<64x16xf32, #tpu.memory_space<vmem>>, vector<64x16xf32>
    tpu.vector_store %arg9[%c0_20, %c0_21], %30 {strides = array<i32>} : memref<64x16xf32, #tpu.memory_space<vmem>>, vector<64x16xf32>,
    return
  }
  func.func @transform_0(%arg0: i32) -> (i32, i32) {
    %c0_i32 = arith.constant 0 : i32
    %c0_i32_0 = arith.constant 0 : i32
    return %arg0, %c0_i32 : i32, i32
  }
  func.func @transform_1(%arg0: i32) -> (i32, i32) {
    %c0_i32 = arith.constant 0 : i32
    %c0_i32_0 = arith.constant 0 : i32
    return %arg0, %c0_i32 : i32, i32
  }
  func.func @transform_2(%arg0: i32) -> (i32, i32) {
    %c0_i32 = arith.constant 0 : i32
    %c0_i32_0 = arith.constant 0 : i32
    %c0_i32_1 = arith.constant 0 : i32
    return %c0_i32, %c0_i32_0 : i32, i32
  }
  func.func @transform_3(%arg0: i32) -> (i32, i32) {
    %c0_i32 = arith.constant 0 : i32
    %c0_i32_0 = arith.constant 0 : i32
    %c0_i32_1 = arith.constant 0 : i32
    return %c0_i32, %c0_i32_0 : i32, i32
  }
  func.func @transform_4(%arg0: i32) -> (i32, i32) {
    %c0_i32 = arith.constant 0 : i32
    %c0_i32_0 = arith.constant 0 : i32
    %c0_i32_1 = arith.constant 0 : i32
    return %c0_i32, %c0_i32_0 : i32, i32
  }
  func.func @transform_5(%arg0: i32) -> (i32, i32) {
    %c0_i32 = arith.constant 0 : i32
    %c0_i32_0 = arith.constant 0 : i32
    %c0_i32_1 = arith.constant 0 : i32
    return %c0_i32, %c0_i32_0 : i32, i32
  }
  func.func @transform_6(%arg0: i32) -> (i32, i32) {
    %c0_i32 = arith.constant 0 : i32
    %c0_i32_0 = arith.constant 0 : i32
    %c0_i32_1 = arith.constant 0 : i32
    return %c0_i32, %c0_i32_0 : i32, i32
  }
  func.func @transform_7(%arg0: i32) -> (i32, i32) {
    %c0_i32 = arith.constant 0 : i32
    %c0_i32_0 = arith.constant 0 : i32
    %c0_i32_1 = arith.constant 0 : i32
    return %c0_i32, %c0_i32_0 : i32, i32
  }
  func.func @transform_8(%arg0: i32) -> (i32, i32) {
    %c0_i32 = arith.constant 0 : i32
    %c0_i32_0 = arith.constant 0 : i32
    return %arg0, %c0_i32 : i32, i32
  }
}

</mosaic_0001>

<bundles_post_ra>
// kernel: tpu_custom_call.1
= control target key start
LH: loop header
LB: loop body
LE: loop exit
PB: predicated region body
PF: predicated region fallthrough
CT: control target
= control target key end

     0   :  { %s1384_s27 = smov 0   ;;  %s1661_s0 = inlined_call_operand.vmem [shape: f32[512,32], index: 0, kind: input, shape index: {}]   ;;  %s1662_s1 = inlined_call_operand.vmem [shape: f32[128,16], index: 1, kind: input, shape index: {}]   ;;  %s1663_s2 = inlined_call_operand.vmem [shape: f32[32,8], index: 2, kind: input, shape index: {}]   ;;  %s1664_s3 = inlined_call_operand.vmem [shape: f32[1,8], index: 3, kind: input, shape index: {}]   ;;  %s1665_s4 = inlined_call_operand.vmem [shape: f32[16,8], index: 4, kind: input, shape index: {}]   ;;  %s1666_s5 = inlined_call_operand.vmem [shape: f32[1,8], index: 5, kind: input, shape index: {}]   ;;  %s1667_s6 = inlined_call_operand.vmem [shape: f32[32,16], index: 6, kind: input, shape index: {}]   ;;  %s1668_s7 = inlined_call_operand.vmem [shape: f32[1,16], index: 7, kind: input, shape index: {}]   ;;  %s1669_s8 = inlined_call_operand.vmem [shape: f32[128,16], index: 8, kind: output, shape index: {}]  }
   0x1 LB: > { %s1179_s28 = sadd.s32 4294967295, %s1337_s27   ;;  %p1183_p0 = scmp.ge.s32.totalorder %s1337_s27, 1  ;;  %s1337_s27 = sphi %s1384_s27, %s18_s27  }
   0x2   : > { %p274_p1 = scmp.lt.s32.totalorder %s1337_s27, 3 }
   0x4   : > { %p275_p2 = pnand %p1183_p0, %p274_p1 }
   0x5   : > { %s1184_s11 = sshll.u32 (!%p275_p2), %s1179_s28, 5  ;;  %s1186_s12 = sshll.u32 (!%p275_p2), %s1179_s28, 3 }
   0x6   : > { %278 = sbr.rel (%p275_p2) target bundleno = 829 (0x33d), region = 52  ;;  %p314_p3 = scmp.lt.s32.totalorder (!%p275_p2), %s1184_s11, 63 }
   0x7   : > { %p320_p4 = scmp.lt.s32.totalorder (!%p275_p2), %s1186_s12, 15 }
   0xb   : > { %v366_v0 = vld [vmem:[%s1663_s2 + $0x18] sm:$0xff]  ;;  %v365_v1 = vld [vmem:[%s1663_s2 + $0x10] sm:$0xff]  ;;  %v364_v2 = vld [vmem:[%s1663_s2 + $0x8] sm:$0xff]  ;;  %s1671_s11 = smov (!%p314_p3, %s1184_s11), 63  ;;  %s1673_s12 = smov (!%p320_p4, %s1186_s12), 15  ;;  %vm371_vm0 = vcmask 261120  }
   0xc   : > { %480 = vmatpush.msra.mxu0 %v366_v0  ;;  %1280 = vmatpush.msra.mxu2 %v366_v0  ;;  %v363_v3 = vld [vmem:[%s1663_s2] sm:$0xff]  ;;  %s1185_s17 = sshll.u32 %s1671_s11, 3  ;;  %s1187_s21 = sshll.u32 %s1673_s12, 3  ;;  %v590_v5 = vld [vmem:[%s1665_s4 + $0x8] sm:$0xff]  ;;  %vm595_vm1 = vcmask 130048   ;;  %vm661_vm2 = vcmask 64512  }
   0xd   : > { %1281 = vmatpush.msra.mxu3 %v366_v0  ;;  %s1409_s20 = scalar_lea.vmem %s1661_s0, %s1185_s17  ;;  %s1418_s24 = scalar_lea.vmem %s1662_s1, %s1187_s21  ;;  %634 = vmatpush.msra.mxu1 %v590_v5  ;;  %v589_v6 = vld [vmem:[%s1665_s4] sm:$0xff] }
   0xe   : > { %481 = vmatpush.msra.mxu0 %v365_v1  ;;  %1282 = vmatpush.msra.mxu2 %v365_v1  ;;  %v331_v4 = vld [vmem:[%s1409_s20] sm:$0xff]  ;;  %v332_v8 = vld [vmem:[%s1409_s20 + $0x8] sm:$0xff]  ;;  %v333_v9 = vld [vmem:[%s1409_s20 + $0x10] sm:$0xff]  ;;  %s329_s26 = scalar_lea.vmem %s1669_s8, %s1187_s21 }
   0xf   : > { %1283 = vmatpush.msra.mxu3 %v365_v1  ;;  %v581_v7 = vld [vmem:[%s1418_s24] sm:$0xff]  ;;  %635 = vmatpush.msra.mxu1 %v589_v6  ;;  %v334_v10 = vld [vmem:[%s1409_s20 + $0x18] sm:$0xff]  ;;  %v348_v13 = vld [vmem:[%s1409_s20 + $0x88] sm:$0xff] }
  0x10   : > { %482 = vmatpush.msra.mxu0 %v364_v2  ;;  %1284 = vmatpush.msra.mxu2 %v364_v2  ;;  %v347_v11 = vld [vmem:[%s1409_s20 + $0x80] sm:$0xff]  ;;  %v582_v14 = vld [vmem:[%s1418_s24 + $0x8] sm:$0xff]  ;;  %v349_v16 = vld [vmem:[%s1409_s20 + $0x90] sm:$0xff] }
  0x11   : > { %1285 = vmatpush.msra.mxu3 %v364_v2  ;;  %1222 = vmatmul.msk.f32.vlgmr.msra.gmra.mxu1 %vm595_vm1, %v581_v7  ;;  %v335_v12 = vld [vmem:[%s1409_s20 + $0x20] sm:$0xff]  ;;  %v336_v15 = vld [vmem:[%s1409_s20 + $0x28] sm:$0xff]  ;;  %v337_v17 = vld [vmem:[%s1409_s20 + $0x30] sm:$0xff] }
  0x12   : > { %483 = vmatpush.msra.mxu0 %v363_v3  ;;  %1286 = vmatpush.msra.mxu2 %v363_v3  ;;  %v350_v18 = vld [vmem:[%s1409_s20 + $0x98] sm:$0xff]  ;;  %v351_v20 = vld [vmem:[%s1409_s20 + $0xa0] sm:$0xff]  ;;  %v356_v21 = vld [vmem:[%s1409_s20 + $0xc8] sm:$0xff] }
  0x13   : > { %1190 = vmatmul.msk.f32.vlgmr.msra.gmra.mxu0 %vm371_vm0, %v331_v4  ;;  %1287 = vmatpush.msra.mxu3 %v363_v3  ;;  %v338_v19 = vld [vmem:[%s1409_s20 + $0x38] sm:$0xff]  ;;  %v339_v22 = vld [vmem:[%s1409_s20 + $0x40] sm:$0xff]  ;;  %v352_v23 = vld [vmem:[%s1409_s20 + $0xa8] sm:$0xff] }
  0x14   : > { %1206 = vmatmul.msk.f32.vlgmr.msra.gmra.mxu2 %vm371_vm0, %v347_v11  ;;  %1215 = vmatmul.msk.f32.vlgmr.msra.gmra.mxu3 %vm371_vm0, %v356_v21  ;;  %v583_v24 = vld [vmem:[%s1418_s24 + $0x10] sm:$0xff]  ;;  %v340_v26 = vld [vmem:[%s1409_s20 + $0x48] sm:$0xff]  ;;  %v584_v28 = vld [vmem:[%s1418_s24 + $0x18] sm:$0xff] }
  0x15   : > { %v357_v25 = vld [vmem:[%s1409_s20 + $0xd0] sm:$0xff]  ;;  %v358_v29 = vld [vmem:[%s1409_s20 + $0xd8] sm:$0xff]  ;;  %v585_v32 = vld [vmem:[%s1418_s24 + $0x20] sm:$0xff] }
  0x16   : > { %v353_v27 = vld [vmem:[%s1409_s20 + $0xb0] sm:$0xff]  ;;  %v354_v31 = vld [vmem:[%s1409_s20 + $0xb8] sm:$0xff]  ;;  %v359_v33 = vld [vmem:[%s1409_s20 + $0xe0] sm:$0xff] }
  0x17   : > { %v341_v30 = vld [vmem:[%s1409_s20 + $0x50] sm:$0xff]  ;;  %v342_v34 = vld [vmem:[%s1409_s20 + $0x58] sm:$0xff]  ;;  %v355_v35 = vld [vmem:[%s1409_s20 + $0xc0] sm:$0xff] }
  0x18   : > { %v586_v36 = vld [vmem:[%s1418_s24 + $0x28] sm:$0xff]  ;;  %v343_v38 = vld [vmem:[%s1409_s20 + $0x60] sm:$0xff]  ;;  %v587_v39 = vld [vmem:[%s1418_s24 + $0x30] sm:$0xff] }
  0x19   : > { %1223 = vmatmul.msk.f32.gmra.mxu1 %vm595_vm1, %v582_v14  ;;  %v360_v37 = vld [vmem:[%s1409_s20 + $0xe8] sm:$0xff]  ;;  %v361_v40 = vld [vmem:[%s1409_s20 + $0xf0] sm:$0xff]  ;;  %v362_v42 = vld [vmem:[%s1409_s20 + $0xf8] sm:$0xff] }
  0x1a   : > { %v344_v41 = vld [vmem:[%s1409_s20 + $0x68] sm:$0xff]  ;;  %v345_v43 = vld [vmem:[%s1409_s20 + $0x70] sm:$0xff]  ;;  %v346_v44 = vld [vmem:[%s1409_s20 + $0x78] sm:$0xff] }
  0x1b   : > { %1191 = vmatmul.msk.f32.gmra.mxu0 %vm371_vm0, %v332_v8  ;;  %v588_v46 = vld [vmem:[%s1418_s24 + $0x38] sm:$0xff]  ;;  %v1508_v49 = vld [vmem:[%s1664_s3] ss:$0 sm:$0xff] }
  0x1c   : > { %1207 = vmatmul.msk.f32.gmra.mxu2 %vm371_vm0, %v348_v13  ;;  %1216 = vmatmul.msk.f32.gmra.mxu3 %vm371_vm0, %v357_v25  ;;  %v1518_v55 = vld [vmem:[%s1666_s5] ss:$0 sm:$0xff] }
  0x21   : > { %1224 = vmatmul.msk.f32.gmra.mxu1 %vm595_vm1, %v583_v24 }
  0x23   : > { %1192 = vmatmul.msk.f32.gmra.mxu0 %vm371_vm0, %v333_v9 }
  0x24   : > { %1208 = vmatmul.msk.f32.gmra.mxu2 %vm371_vm0, %v349_v16  ;;  %1217 = vmatmul.msk.f32.gmra.mxu3 %vm371_vm0, %v358_v29 }
  0x29   : > { %1225 = vmatmul.msk.f32.gmra.mxu1 %vm595_vm1, %v584_v28 }
  0x2b   : > { %1193 = vmatmul.msk.f32.gmra.mxu0 %vm371_vm0, %v334_v10 }
  0x2c   : > { %1209 = vmatmul.msk.f32.gmra.mxu2 %vm371_vm0, %v350_v18  ;;  %1218 = vmatmul.msk.f32.gmra.mxu3 %vm371_vm0, %v359_v33 }
  0x31   : > { %1226 = vmatmul.msk.f32.gmra.mxu1 %vm595_vm1, %v585_v32 }
  0x33   : > { %1194 = vmatmul.msk.f32.gmra.mxu0 %vm371_vm0, %v335_v12 }
  0x34   : > { %1210 = vmatmul.msk.f32.gmra.mxu2 %vm371_vm0, %v351_v20  ;;  %1219 = vmatmul.msk.f32.gmra.mxu3 %vm371_vm0, %v360_v37 }
  0x39   : > { %1227 = vmatmul.msk.f32.gmra.mxu1 %vm595_vm1, %v586_v36 }
  0x3b   : > { %1195 = vmatmul.msk.f32.gmra.mxu0 %vm371_vm0, %v336_v15 }
  0x3c   : > { %1211 = vmatmul.msk.f32.gmra.mxu2 %vm371_vm0, %v352_v23  ;;  %1220 = vmatmul.msk.f32.gmra.mxu3 %vm371_vm0, %v361_v40 }
  0x41   : > { %1228 = vmatmul.msk.f32.gmra.mxu1 %vm595_vm1, %v587_v39 }
  0x43   : > { %1196 = vmatmul.msk.f32.gmra.mxu0 %vm371_vm0, %v337_v17 }
  0x44   : > { %1212 = vmatmul.msk.f32.gmra.mxu2 %vm371_vm0, %v353_v27  ;;  %1221 = vmatmul.msk.f32.gmra.mxu3 %vm371_vm0, %v362_v42 }
  0x49   : > { %1229 = vmatmul.msk.f32.gmra.mxu1 %vm595_vm1, %v588_v46 }
  0x4b   : > { %1197 = vmatmul.msk.f32.gmra.mxu0 %vm371_vm0, %v338_v19 }
  0x4c   : > { %1213 = vmatmul.msk.f32.gmra.mxu2 %vm371_vm0, %v354_v31 }
  0x53   : > { %1198 = vmatmul.msk.f32.gmra.mxu0 %vm371_vm0, %v339_v22 }
  0x54   : > { %1214 = vmatmul.msk.f32.gmra.mxu2 %vm371_vm0, %v355_v35 }
  0x5b   : > { %1199 = vmatmul.msk.f32.gmra.mxu0 %vm371_vm0, %v340_v26 }
  0x63   : > { %1200 = vmatmul.msk.f32.gmra.mxu0 %vm371_vm0, %v341_v30 }
  0x6b   : > { %1201 = vmatmul.msk.f32.gmra.mxu0 %vm371_vm0, %v342_v34 }
  0x73   : > { %1202 = vmatmul.msk.f32.gmra.mxu0 %vm371_vm0, %v343_v38 }
  0x7b   : > { %1203 = vmatmul.msk.f32.gmra.mxu0 %vm371_vm0, %v344_v41 }
  0x83   : > { %1204 = vmatmul.msk.f32.gmra.mxu0 %vm371_vm0, %v345_v43 }
  0x8b   : > { %1205 = vmatmul.msk.f32.gmra.mxu0 %vm371_vm0, %v346_v44 }
  0x8e   : > { %v637_v56 = vpop.f32.mrf.mxu1 }
  0x8f   : > { %v638_v58 = vadd.f32 %v1518_v55, %v637_v56 }
  0x90   : > { %v485_v45 = vpop.f32.mrf.mxu0 }
  0x91   : > { %v486_v57 = vadd.f32 %v1508_v49, %v485_v45 }
  0x96   : > { %v640_v5 = vpop.f32.mrf.mxu1 }
  0x97   : > { %v533_v60 = vpop.f32.mrf.mxu2  ;;  %v641_v7 = vadd.f32 %v1518_v55, %v640_v5  ;;  %v560_v12 = vpop.f32.mrf.mxu3 }
  0x98   : > { %v488_v47 = vpop.f32.mrf.mxu0  ;;  %v534_v35 = vadd.f32 %v1508_v49, %v533_v60  ;;  %v561_v43 = vadd.f32 %v1508_v49, %v560_v12 }
  0x99   : > { %v489_v54 = vadd.f32 %v1508_v49, %v488_v47 }
  0x9e   : > { %v643_v13 = vpop.f32.mrf.mxu1 }
  0x9f   : > { %v536_v62 = vpop.f32.mrf.mxu2  ;;  %v563_v17 = vpop.f32.mrf.mxu3  ;;  %v644_v25 = vadd.f32 %v1518_v55, %v643_v13 }
  0xa0   : > { %v491_v48 = vpop.f32.mrf.mxu0  ;;  %v537_v30 = vadd.f32 %v1508_v49, %v536_v62  ;;  %v564_v38 = vadd.f32 %v1508_v49, %v563_v17 }
  0xa1   : > { %v492_v52 = vadd.f32 %v1508_v49, %v491_v48 }
  0xa6   : > { %v646_v19 = vpop.f32.mrf.mxu1 }
  0xa7   : > { %v539_v2 = vpop.f32.mrf.mxu2  ;;  %v566_v26 = vpop.f32.mrf.mxu3 }
  0xa8   : > { %v494_v50 = vpop.f32.mrf.mxu0  ;;  %v540_v29 = vadd.f32 %v1508_v49, %v539_v2  ;;  %v567_v34 = vadd.f32 %v1508_v49, %v566_v26 }
  0xa9   : > { %v495_v51 = vadd.f32 %v1508_v49, %v494_v50 }
  0xab   : > { %1230 = vmatpush.xpose.msk.msrb.mxu2 %vm661_vm2, %v495_v51 }
  0xae   : > { %v649_v28 = vpop.f32.mrf.mxu1 }
  0xaf   : > { %1231 = vmatpush.xpose.msk.msrb.mxu2 %vm661_vm2, %v492_v52  ;;  %v542_v8 = vpop.f32.mrf.mxu2  ;;  %v569_v33 = vpop.f32.mrf.mxu3  ;;  %v650_v36 = vadd.f32 %v1518_v55, %v649_v28 }
  0xb0   : > { %v497_v53 = vpop.f32.mrf.mxu0  ;;  %v543_v22 = vadd.f32 %v1508_v49, %v542_v8 }
  0xb1   : > { %v498_v6 = vadd.f32 %v1508_v49, %v497_v53  ;;  %v647_v53 = vadd.f32 %v1518_v55, %v646_v19 }
  0xb3   : > { %1232 = vmatpush.xpose.msk.msrb.mxu2 %vm661_vm2, %v489_v54 }
  0xb6   : > { %v652_v37 = vpop.f32.mrf.mxu1 }
  0xb7   : > { %1233 = vmatpush.xpose.msk.msrb.mxu2 %vm661_vm2, %v486_v57  ;;  %v1535_v11 = vpop.f32.mrf.mxu2  ;;  %v572_v42 = vpop.f32.mrf.mxu3  ;;  %v653_v60 = vadd.f32 %v1518_v55, %v652_v37 }
  0xb8   : > { %v500_v59 = vpop.f32.mrf.mxu0  ;;  %v573_v62 = vadd.f32 %v1508_v49, %v572_v42 }
  0xb9   : > { %v501_v4 = vadd.f32 %v1508_v49, %v500_v59  ;;  %v546_v59 = vadd.f32 %v1508_v49, %v1535_v11 }
  0xba   : > { %1234 = vmatmul.msk.f32.vlgmr.msrb.gmra.mxu2 %vm661_vm2, %v638_v58 }
  0xbe   : > { %v655_v46 = vpop.f32.mrf.mxu1 }
  0xbf   : > { %v548_v16 = vpop.f32.mrf.mxu2  ;;  %v656_v47 = vadd.f32 %v1518_v55, %v655_v46  ;;  %v575_v51 = vpop.f32.mrf.mxu3 }
  0xc0   : > { %v503_v61 = vpop.f32.mrf.mxu0  ;;  %v549_v56 = vadd.f32 %v1508_v49, %v548_v16 }
  0xc1   : > { %v504_v1 = vadd.f32 %v1508_v49, %v503_v61  ;;  %v576_v61 = vadd.f32 %v1508_v49, %v575_v51 }
  0xc7   : > { %v551_v24 = vpop.f32.mrf.mxu2  ;;  %v578_v57 = vpop.f32.mrf.mxu3 }
  0xc8   : > { %v506_v63 = vpop.f32.mrf.mxu0  ;;  %v552_v54 = vadd.f32 %v1508_v49, %v551_v24  ;;  %v579_v58 = vadd.f32 %v1508_v49, %v578_v57 }
  0xc9   : > { %v507_v0 = vadd.f32 %v1508_v49, %v506_v63  ;;  %v658_v63 = vpop.f32.mrf.mxu1 }
  0xcb   : > { %1235 = vmatpush.xpose.msk.msrb.mxu3 %vm661_vm2, %v507_v0  ;;  %v570_v0 = vadd.f32 %v1508_v49, %v569_v33 }
  0xcf   : > { %1236 = vmatpush.xpose.msk.msrb.mxu3 %vm661_vm2, %v504_v1  ;;  %v554_v31 = vpop.f32.mrf.mxu2  ;;  %v659_v1 = vadd.f32 %v1518_v55, %v658_v63 }
  0xd0   : > { %v509_v3 = vpop.f32.mrf.mxu0  ;;  %v555_v50 = vadd.f32 %v1508_v49, %v554_v31 }
  0xd1   : > { %v510_v23 = vadd.f32 %v1508_v49, %v509_v3 }
  0xd3   : > { %1237 = vmatpush.xpose.msk.msrb.mxu3 %vm661_vm2, %v501_v4 }
  0xd7   : > { %1238 = vmatpush.xpose.msk.msrb.mxu3 %vm661_vm2, %v498_v6  ;;  %v557_v41 = vpop.f32.mrf.mxu2 }
  0xd8   : > { %v512_v9 = vpop.f32.mrf.mxu0  ;;  %v558_v45 = vadd.f32 %v1508_v49, %v557_v41 }
  0xd9   : > { %v513_v21 = vadd.f32 %v1508_v49, %v512_v9 }
  0xda   : > { %1239 = vmatmul.msk.f32.vlgmr.msrb.gmra.mxu3 %vm661_vm2, %v641_v7 }
  0xe0   : > { %v515_v10 = vpop.f32.mrf.mxu0 }
  0xe1   : > { %v516_v18 = vadd.f32 %v1508_v49, %v515_v10 }
  0xe8   : > { %v518_v14 = vpop.f32.mrf.mxu0 }
  0xe9   : > { %v519_v15 = vadd.f32 %v1508_v49, %v518_v14 }
  0xeb   : > { %1240 = vmatpush.xpose.msk.msra.mxu2 %vm661_vm2, %v519_v15 }
  0xef   : > { %1241 = vmatpush.xpose.msk.msra.mxu2 %vm661_vm2, %v516_v18 }
  0xf0   : > { %v521_v20 = vpop.f32.mrf.mxu0 }
  0xf1   : > { %v522_v52 = vadd.f32 %v1508_v49, %v521_v20 }
  0xf3   : > { %1242 = vmatpush.xpose.msk.msra.mxu2 %vm661_vm2, %v513_v21 }
  0xf7   : > { %1243 = vmatpush.xpose.msk.msra.mxu2 %vm661_vm2, %v510_v23 }
  0xf8   : > { %v524_v27 = vpop.f32.mrf.mxu0 }
  0xf9   : > { %v525_v48 = vadd.f32 %v1508_v49, %v524_v27 }
  0xfa   : > { %1244 = vmatmul.msk.f32.vlgmr.msra.gmra.mxu2 %vm661_vm2, %v644_v25 }
  0xfb   : > { %1250 = vmatpush.xpose.msk.msrb.mxu2 %vm661_vm2, %v543_v22 }
  0xff   : > { %1251 = vmatpush.xpose.msk.msrb.mxu2 %vm661_vm2, %v540_v29 }
 0x100   : > { %v527_v32 = vpop.f32.mrf.mxu0 }
 0x101   : > { %v528_v44 = vadd.f32 %v1508_v49, %v527_v32 }
 0x103   : > { %1252 = vmatpush.xpose.msk.msrb.mxu2 %vm661_vm2, %v537_v30 }
 0x107   : > { %1253 = vmatpush.xpose.msk.msrb.mxu2 %vm661_vm2, %v534_v35 }
 0x108   : > { %v530_v39 = vpop.f32.mrf.mxu0 }
 0x109   : > { %v531_v40 = vadd.f32 %v1508_v49, %v530_v39  ;;  %v1033_v39 = vld [vmem:[%s1667_s6 + $0x18] sm:$0xff] }
 0x10a   : > { %1254 = vmatmul.msk.f32.vlgmr.msrb.gmra.mxu2 %vm661_vm2, %v650_v36  ;;  %1074 = vmatpush.msrb.mxu1 %v1033_v39 }
 0x10b   : > { %1260 = vmatpush.xpose.msk.msra.mxu2 %vm661_vm2, %v567_v34  ;;  %1245 = vmatpush.xpose.msk.msra.mxu3 %vm661_vm2, %v531_v40  ;;  %v1032_v40 = vld [vmem:[%s1667_s6 + $0x10] sm:$0xff] }
 0x10c   : > { %1075 = vmatpush.msrb.mxu1 %v1032_v40 }
 0x10f   : > { %1261 = vmatpush.xpose.msk.msra.mxu2 %vm661_vm2, %v564_v38  ;;  %1246 = vmatpush.xpose.msk.msra.mxu3 %vm661_vm2, %v528_v44 }
 0x113   : > { %1262 = vmatpush.xpose.msk.msra.mxu2 %vm661_vm2, %v561_v43  ;;  %1247 = vmatpush.xpose.msk.msra.mxu3 %vm661_vm2, %v525_v48  ;;  %v1031_v43 = vld [vmem:[%s1667_s6 + $0x8] sm:$0xff] }
 0x114   : > { %1076 = vmatpush.msrb.mxu1 %v1031_v43 }
 0x117   : > { %1263 = vmatpush.xpose.msk.msra.mxu2 %vm661_vm2, %v558_v45  ;;  %1248 = vmatpush.xpose.msk.msra.mxu3 %vm661_vm2, %v522_v52  ;;  %v1030_v45 = vld [vmem:[%s1667_s6] sm:$0xff] }
 0x118   : > { %1077 = vmatpush.msrb.mxu1 %v1030_v45 }
 0x11a   : > { %1264 = vmatmul.msk.f32.vlgmr.msra.gmra.mxu2 %vm661_vm2, %v656_v47  ;;  %1249 = vmatmul.msk.f32.vlgmr.msra.gmra.mxu3 %vm661_vm2, %v647_v53 }
 0x11b   : > { %1255 = vmatpush.xpose.msk.msrb.mxu3 %vm661_vm2, %v555_v50 }
 0x11f   : > { %1256 = vmatpush.xpose.msk.msrb.mxu3 %vm661_vm2, %v552_v54 }
 0x123   : > { %1257 = vmatpush.xpose.msk.msrb.mxu3 %vm661_vm2, %v549_v56 }
 0x127   : > { %1258 = vmatpush.xpose.msk.msrb.mxu3 %vm661_vm2, %v546_v59 }
 0x12a   : > { %1259 = vmatmul.msk.f32.vlgmr.msrb.gmra.mxu3 %vm661_vm2, %v653_v60 }
 0x12b   : > { %1265 = vmatpush.xpose.msk.msra.mxu3 %vm661_vm2, %v579_v58 }
 0x12f   : > { %1266 = vmatpush.xpose.msk.msra.mxu3 %vm661_vm2, %v576_v61 }
 0x133   : > { %1267 = vmatpush.xpose.msk.msra.mxu3 %vm661_vm2, %v573_v62 }
 0x137   : > { %1268 = vmatpush.xpose.msk.msra.mxu3 %vm661_vm2, %v570_v0 }
 0x13a   : > { %1269 = vmatmul.msk.f32.vlgmr.msra.gmra.mxu3 %vm661_vm2, %v659_v1 }
 0x13d   : > { %v694_v2 = vpop.f32.mrf.mxu2 }
 0x13e   : > { %v942_v3 = vsel %vm371_vm0, %v694_v2, -inf }
 0x13f   : > { %943 = vmax.xlane.f32.xlu0 %v942_v3 }
 0x15d   : > { %v729_v4 = vpop.f32.mrf.mxu3 }
 0x15e   : > { %v945_v5 = vsel %vm371_vm0, %v729_v4, -inf }
 0x15f   : > { %946 = vmax.xlane.f32.xlu0 %v945_v5 }
 0x17d   : > { %v764_v6 = vpop.f32.mrf.mxu2 }
 0x17e   : > { %v948_v7 = vsel %vm371_vm0, %v764_v6, -inf }
 0x17f   : > { %949 = vmax.xlane.f32.xlu1 %v948_v7 }
 0x18d   : > { %v834_v8 = vpop.f32.mrf.mxu2 }
 0x18e   : > { %v954_v49 = vsel %vm371_vm0, %v834_v8, -inf }
 0x18f   : > { %955 = vmax.xlane.f32.xlu2 %v954_v49 }
 0x19d   : > { %v904_v55 = vpop.f32.mrf.mxu2  ;;  %v799_v10 = vpop.f32.mrf.mxu3 }
 0x19e   : > { %v960_v9 = vsel %vm371_vm0, %v904_v55, -inf  ;;  %v951_v11 = vsel %vm371_vm0, %v799_v10, -inf }
 0x19f   : > { %961 = vmax.xlane.f32.xlu0 %v960_v9  ;;  %952 = vmax.xlane.f32.xlu1 %v951_v11 }
 0x1ad   : > { %v869_v12 = vpop.f32.mrf.mxu3 }
 0x1ae   : > { %v957_v13 = vsel %vm371_vm0, %v869_v12, -inf }
 0x1af   : > { %958 = vmax.xlane.f32.xlu2 %v957_v13 }
 0x1b2   : > { %v944_v14 = vpop.xlane.xlu0 %943 }
 0x1b3   : > { %v966_v15 = vsub.f32 %v694_v2, %v944_v14 }
 0x1b5   : > { %v974_v16 = vmul.f32 1.442695, %v966_v15 }
 0x1b7   : > { %1299 = vpow2.f32 %v974_v16 }
 0x1bd   : > { %v939_v17 = vpop.f32.mrf.mxu3  ;;  %v1606_v19 = vpop.eup %1299 }
 0x1be   : > { %v963_v18 = vsel %vm371_vm0, %v939_v17, -inf  ;;  %v990_v20 = vsel %vm371_vm0, %v1606_v19, 0.0 }
 0x1bf   : > { %964 = vmax.xlane.f32.xlu2 %v963_v18  ;;  %991 = vadd.xlane.f32.xlu1 %v990_v20  ;;  %v1298_v18 = vld [vmem:[%s1668_s7] ss:$0 sm:$0xff] }
 0x1d2   : > { %v947_v21 = vpop.xlane.xlu0 %946 }
 0x1d3   : > { %v967_v22 = vsub.f32 %v729_v4, %v947_v21 }
 0x1d5   : > { %v976_v23 = vmul.f32 1.442695, %v967_v22 }
 0x1d7   : > { %1301 = vpow2.f32 %v976_v23 }
 0x1dd   : > { %v1302_v24 = vpop.eup %1301 }
 0x1de   : > { %v993_v25 = vsel %vm371_vm0, %v1302_v24, 0.0 }
 0x1df   : > { %994 = vadd.xlane.f32.xlu0 %v993_v25 }
 0x1f2   : > { %v950_v26 = vpop.xlane.xlu1 %949 }
 0x1f3   : > { %v968_v27 = vsub.f32 %v764_v6, %v950_v26 }
 0x1f5   : > { %v978_v28 = vmul.f32 1.442695, %v968_v27 }
 0x1f7   : > { %1303 = vpow2.f32 %v978_v28 }
 0x1fd   : > { %v1304_v29 = vpop.eup %1303 }
 0x1fe   : > { %v996_v30 = vsel %vm371_vm0, %v1304_v29, 0.0 }
 0x1ff   : > { %997 = vadd.xlane.f32.xlu1 %v996_v30 }
 0x202   : > { %v956_v31 = vpop.xlane.xlu2 %955 }
 0x203   : > { %v970_v32 = vsub.f32 %v834_v8, %v956_v31 }
 0x205   : > { %v982_v33 = vmul.f32 1.442695, %v970_v32 }
 0x207   : > { %1305 = vpow2.f32 %v982_v33 }
 0x20d   : > { %v1612_v34 = vpop.eup %1305 }
 0x20e   : > { %v1002_v35 = vsel %vm371_vm0, %v1612_v34, 0.0 }
 0x20f   : > { %1003 = vadd.xlane.f32.xlu0 %v1002_v35 }
 0x212   : > { %v962_v36 = vpop.xlane.xlu0 %961  ;;  %v953_v37 = vpop.xlane.xlu1 %952 }
 0x213   : > { %v969_v38 = vsub.f32 %v799_v10, %v953_v37  ;;  %v972_v41 = vsub.f32 %v904_v55, %v962_v36 }
 0x215   : > { %v980_v42 = vmul.f32 1.442695, %v969_v38  ;;  %v986_v44 = vmul.f32 1.442695, %v972_v41 }
 0x217   : > { %1307 = vpow2.f32 %v980_v42 }
 0x218   : > { %1309 = vpow2.f32 %v986_v44 }
 0x21d   : > { %v1308_v46 = vpop.eup %1307 }
 0x21e   : > { %v999_v47 = vsel %vm371_vm0, %v1308_v46, 0.0  ;;  %v1310_v52 = vpop.eup %1309 }
 0x21f   : > { %1000 = vadd.xlane.f32.xlu2 %v999_v47  ;;  %v1008_v53 = vsel %vm371_vm0, %v1310_v52, 0.0 }
 0x222   : > { %v959_v48 = vpop.xlane.xlu2 %958 }
 0x223   : > { %v971_v50 = vsub.f32 %v869_v12, %v959_v48 }
 0x225   : > { %v984_v51 = vmul.f32 1.442695, %v971_v50 }
 0x227   : > { %1311 = vpow2.f32 %v984_v51  ;;  %1009 = vadd.xlane.f32.xlu2 %v1008_v53 }
 0x22d   : > { %v1312_v54 = vpop.eup %1311 }
 0x22e   : > { %v1005_v56 = vsel %vm371_vm0, %v1312_v54, 0.0 }
 0x22f   : > { %1006 = vadd.xlane.f32.xlu1 %v1005_v56 }
 0x232   : > { %v965_v57 = vpop.xlane.xlu2 %964  ;;  %v992_v60 = vpop.xlane.xlu1 %991 }
 0x233   : > { %v973_v58 = vsub.f32 %v939_v17, %v965_v57 }
 0x235   : > { %v988_v59 = vmul.f32 1.442695, %v973_v58 }
 0x237   : > { %1313 = vpow2.f32 %v988_v59 }
 0x238   : > { %1315 = vrcp.f32 %v992_v60 }
 0x23d   : > { %v1314_v61 = vpop.eup %1313 }
 0x23e   : > { %v1011_v62 = vsel %vm371_vm0, %v1314_v61, 0.0  ;;  %v1316_v63 = vpop.eup %1315 }
 0x23f   : > { %1012 = vadd.xlane.f32.xlu0 %v1011_v62  ;;  %v1022_v0 = vmul.f32 %v1316_v63, %v1606_v19 }
 0x241   : > { %1270 = vmatmul.msk.f32.vlgmr.msrb.gmra.mxu1 %vm371_vm0, %v1022_v0 }
 0x252   : > { %v995_v1 = vpop.xlane.xlu0 %994 }
 0x253   : > { %1317 = vrcp.f32 %v995_v1 }
 0x259   : > { %v1318_v2 = vpop.eup %1317 }
 0x25a   : > { %v1023_v3 = vmul.f32 %v1318_v2, %v1302_v24 }
 0x25c   : > { %1271 = vmatmul.msk.f32.gmra.mxu1 %vm371_vm0, %v1023_v3 }
 0x272   : > { %v998_v4 = vpop.xlane.xlu1 %997 }
 0x273   : > { %1319 = vrcp.f32 %v998_v4 }
 0x279   : > { %v1320_v5 = vpop.eup %1319 }
 0x27a   : > { %v1024_v6 = vmul.f32 %v1320_v5, %v1304_v29 }
 0x27c   : > { %1272 = vmatmul.msk.f32.gmra.mxu1 %vm371_vm0, %v1024_v6 }
 0x282   : > { %v1004_v8 = vpop.xlane.xlu0 %1003 }
 0x292   : > { %v1001_v7 = vpop.xlane.xlu2 %1000 }
 0x293   : > { %1321 = vrcp.f32 %v1001_v7 }
 0x294   : > { %1323 = vrcp.f32 %v1004_v8 }
 0x299   : > { %v1322_v49 = vpop.eup %1321 }
 0x29a   : > { %v1025_v55 = vmul.f32 %v1322_v49, %v1308_v46  ;;  %v1324_v9 = vpop.eup %1323  ;;  %v1010_v12 = vpop.xlane.xlu2 %1009 }
 0x29b   : > { %v1026_v11 = vmul.f32 %v1324_v9, %v1612_v34 }
 0x29c   : > { %1273 = vmatmul.msk.f32.gmra.mxu1 %vm371_vm0, %v1025_v55 }
 0x2a2   : > { %v1007_v10 = vpop.xlane.xlu1 %1006 }
 0x2a3   : > { %1325 = vrcp.f32 %v1007_v10 }
 0x2a4   : > { %1274 = vmatmul.msk.f32.gmra.mxu1 %vm371_vm0, %v1026_v11  ;;  %1327 = vrcp.f32 %v1010_v12 }
 0x2a9   : > { %v1326_v13 = vpop.eup %1325 }
 0x2aa   : > { %v1027_v14 = vmul.f32 %v1326_v13, %v1312_v54  ;;  %v1328_v16 = vpop.eup %1327 }
 0x2ab   : > { %v1028_v17 = vmul.f32 %v1328_v16, %v1310_v52 }
 0x2ac   : > { %1275 = vmatmul.msk.f32.gmra.mxu1 %vm371_vm0, %v1027_v14 }
 0x2b2   : > { %v1013_v15 = vpop.xlane.xlu0 %1012 }
 0x2b3   : > { %1329 = vrcp.f32 %v1013_v15 }
 0x2b4   : > { %1276 = vmatmul.msk.f32.gmra.mxu1 %vm371_vm0, %v1028_v17 }
 0x2b9   : > { %v1330_v19 = vpop.eup %1329 }
 0x2ba   : > { %v1029_v22 = vmul.f32 %v1330_v19, %v1314_v61 }
 0x2bc   : > { %1277 = vmatmul.msk.f32.gmra.mxu1 %vm371_vm0, %v1029_v22 }
 0x2be   : > { %v1079_v20 = vpop.f32.mrf.mxu1 }
 0x2bf   : > { %v1080_v21 = vadd.f32 %v1298_v18, %v1079_v20 }
 0x2c1   : > { %1103 = vst.msk [vmem:[%s329_s26] sm:$0xff] %vm595_vm1, %v1080_v21 }
 0x2d9   : > { %v1082_v23 = vpop.f32.mrf.mxu1 }
 0x2da   : > { %v1083_v24 = vadd.f32 %v1298_v18, %v1082_v23 }
 0x2dc   : > { %1104 = vst.msk [vmem:[%s329_s26 + $0x8] sm:$0xff] %vm595_vm1, %v1083_v24 }
 0x2f9   : > { %v1085_v25 = vpop.f32.mrf.mxu1 }
 0x2fa   : > { %v1086_v26 = vadd.f32 %v1298_v18, %v1085_v25 }
 0x2fc   : > { %1105 = vst.msk [vmem:[%s329_s26 + $0x10] sm:$0xff] %vm595_vm1, %v1086_v26 }
 0x319   : > { %v1088_v27 = vpop.f32.mrf.mxu1 }
 0x31a   : > { %v1089_v28 = vadd.f32 %v1298_v18, %v1088_v27 }
 0x31c   : > { %1106 = vst.msk [vmem:[%s329_s26 + $0x18] sm:$0xff] %vm595_vm1, %v1089_v28 }
 0x321   : > { %v1091_v29 = vpop.f32.mrf.mxu1 }
 0x322   : > { %v1092_v30 = vadd.f32 %v1298_v18, %v1091_v29 }
 0x324   : > { %1107 = vst.msk [vmem:[%s329_s26 + $0x20] sm:$0xff] %vm595_vm1, %v1092_v30 }
 0x329   : > { %v1094_v31 = vpop.f32.mrf.mxu1 }
 0x32a   : > { %v1095_v32 = vadd.f32 %v1298_v18, %v1094_v31 }
 0x32c   : > { %1108 = vst.msk [vmem:[%s329_s26 + $0x28] sm:$0xff] %vm595_vm1, %v1095_v32 }
 0x331   : > { %v1097_v33 = vpop.f32.mrf.mxu1 }
 0x332   : > { %v1098_v34 = vadd.f32 %v1298_v18, %v1097_v33 }
 0x334   : > { %1109 = vst.msk [vmem:[%s329_s26 + $0x30] sm:$0xff] %vm595_vm1, %v1098_v34 }
 0x339   : > { %v1100_v35 = vpop.f32.mrf.mxu1 }
 0x33a   : > { %v1101_v36 = vadd.f32 %v1298_v18, %v1100_v35 }
 0x33c   : > { %1110 = vst.msk [vmem:[%s329_s26 + $0x38] sm:$0xff] %vm595_vm1, %v1101_v36 }
 0x33d PF: > { %s18_s27 = sadd.s32 1, %s1337_s27  }
 0x33e   : > { %p15_p5 = scmp.ge.s32.totalorder %s18_s27, 4  }
 0x340   :  { %17 = sbr.rel (!%p15_p5) target bundleno = 1 (0x1), region = 85 }

</bundles_post_ra>
